<compile_context>
chip_gen: v7x
topology: tpu7x:2x2x1
jax: 0.10.0
libtpu: 0.0.40
codegen_flags: <defaults>
</compile_context>

<pallas_src>
import jax
import jax.numpy as jnp
from jax.experimental import pallas as pl
from jax.experimental.pallas import tpu as pltpu


def _chip_info():
    """Returns (num_tensorcores_per_device, vmem_bytes_per_tensorcore)."""
    kind = ""
    try:
        kind = jax.devices()[0].device_kind.lower()
    except Exception:
        pass
    if "v7" in kind:
        return 2, 64 * 1024 * 1024          # v7x: 2 TCs per chip, 64 MiB VMEM each
    if "v5p" in kind or "v4" in kind:
        return 2, 128 * 1024 * 1024         # megacore chips
    return 1, 128 * 1024 * 1024             # v5e / v6e: single TensorCore, 128 MiB


def _pick_batch_tile(n, per_elem_bytes, fixed_bytes, budget_bytes, num_tc):
    """Largest batch tile that (a) divides n, (b) fits the VMEM budget and
    (c) on multi-TensorCore chips leaves >= num_tc (preferably a multiple of
    num_tc) grid steps so the 'parallel' axis keeps every core busy.  On
    single-core chips grid == 1 is best (fewer steps -> less per-step pipeline
    overhead and better MXU row occupancy)."""
    feasible = []
    for tb in range(1, n + 1):
        if n % tb:
            continue
        if fixed_bytes + tb * per_elem_bytes > budget_bytes:
            continue
        steps = n // tb
        if num_tc > 1 and n >= num_tc and steps < num_tc:
            continue
        feasible.append((tb, steps))
    if not feasible:
        return 1
    even = [tb for tb, steps in feasible if steps % num_tc == 0]
    return max(even) if even else max(tb for tb, _ in feasible)


def make_self_attention_kernel(embed_size, heads, seq_lens, batch_tile,
                               mm_dtype, approx_reciprocal):
    E, H = embed_size, heads
    D = E // H
    v_len, k_len, q_len = seq_lens
    TB = batch_tile
    TZ = TB * H          # fused (batch, head) rows handled per grid step

    def kernel(v_ref, k_ref, q_ref, mask_ref,
               wv_ref, wk_ref, wq_ref, wo_ref, bo_ref, o_ref):
        # ---- per-head projections (weight shared across heads -> one
        # (TZ*L, D) @ (D, D) MXU matmul each; the 1/sqrt(E) softmax scale is
        # pre-folded into the query weight in the wrapper).
        vp = jnp.dot(v_ref[...].reshape(TZ * v_len, D), wv_ref[...],
                     preferred_element_type=jnp.float32)
        kp = jnp.dot(k_ref[...].reshape(TZ * k_len, D), wk_ref[...],
                     preferred_element_type=jnp.float32)
        qp = jnp.dot(q_ref[...].reshape(TZ * q_len, D), wq_ref[...],
                     preferred_element_type=jnp.float32)

        qh = qp.reshape(TZ, q_len, D).astype(mm_dtype)
        kh = kp.reshape(TZ, k_len, D).astype(mm_dtype)
        vh = vp.reshape(TZ, v_len, D).astype(mm_dtype)

        # ---- attention: single batched dot_general over the fused
        # (batch*head) axis -- no per-head lane slices / unrolled head loop.
        energy = jnp.einsum("zqd,zkd->zqk", qh, kh,
                            preferred_element_type=jnp.float32)   # (TZ,Lq,Lk)

        # Compact int8 mask expanded in-kernel; compare+select reproduces
        # masked_fill exactly (fully-masked rows -> uniform attention).
        mask_f = mask_ref[...].astype(jnp.float32)
        energy = jnp.where(mask_f == 1.0, jnp.float32(-1e20), energy)

        # softmax over the key axis, strictly in f32.
        e_max = jnp.max(energy, axis=-1, keepdims=True)
        p = jnp.exp(energy - e_max)
        denom = jnp.sum(p, axis=-1, keepdims=True)
        if approx_reciprocal:
            att = p * pl.reciprocal(denom, approx=True)    # EUP slot
        else:
            att = p / denom

        oh = jnp.einsum("zqk,zkd->zqd", att.astype(mm_dtype), vh,
                        preferred_element_type=jnp.float32)        # (TZ,Lq,D)

        # ---- fc_out folded in: batched per-head matmul with the matching
        # (D, E) slice of W_fc^T (wo_ref is pre-tiled to (TZ, D, E) in the
        # wrapper), then summed over heads.  Mathematically identical to
        # concat(heads) @ W_fc^T without any in-kernel head concat/transpose.
        fc = jnp.einsum("zqd,zde->zqe", oh.astype(mm_dtype), wo_ref[...],
                        preferred_element_type=jnp.float32)        # (TZ,Lq,E)
        out = jnp.sum(fc.reshape(TB, H, q_len, E), axis=1)         # (TB,Lq,E)
        out = out + bo_ref[...]                                    # (1,E) bcast

        o_ref[...] = out.astype(o_ref.dtype)

    return kernel


def self_attention_forward(values, keys, query, mask, inverse_mask, params, *,
                           matmul_dtype=jnp.bfloat16, approx_reciprocal=True):
    """Pallas TPU forward pass of the PyTorch SelfAttention module.

    `inverse_mask` is accepted for API parity with the module but is unused by
    its forward pass."""
    del inverse_mask
    N, q_len, E = query.shape
    v_len = values.shape[1]
    k_len = keys.shape[1]
    assert v_len == k_len, "attention requires value_len == key_len"
    H = params["heads"]
    D = E // H
    assert D * H == E
    out_dtype = query.dtype
    scale = 1.0 / (float(E) ** 0.5)
    mm_b = jnp.dtype(matmul_dtype).itemsize
    out_b = jnp.dtype(out_dtype).itemsize

    # -------- wrapper-side layout / dtype prep (plain XLA, once per call) ---
    # Heads are folded into the leading (batch) axis so the kernel needs only
    # leading-axis reshapes and single-batch-dim matmuls.
    def split_heads(x, seq_len):
        return (x.reshape(N, seq_len, H, D).transpose(0, 2, 1, 3)
                 .reshape(N * H, seq_len, D).astype(matmul_dtype))

    vz = split_heads(values, v_len)
    kz = split_heads(keys, k_len)
    qz = split_heads(query, q_len)

    # Compact int8 mask (1 byte/entry instead of an f32 bias stream).
    mask_full = jnp.broadcast_to(mask, (N, H, q_len, k_len))
    mask_i8 = mask_full.reshape(N * H, q_len, k_len).astype(jnp.int8)

    # Per-head projection weights (shared across heads), right-multiply form;
    # the 1/sqrt(E) softmax scale is folded into the query weight.
    wv_t = params["w_values"].T.astype(matmul_dtype)                # (D, D)
    wk_t = params["w_keys"].T.astype(matmul_dtype)                  # (D, D)
    wq_t = (params["w_query"].T * scale).astype(matmul_dtype)       # (D, D)
    b_fc = params["b_fc"].astype(jnp.float32)                       # (1, E)

    # -------- generation-aware batch tile / VMEM budget ---------------------
    num_tc, vmem_bytes = _chip_info()
    vmem_limit = int(vmem_bytes * 3 // 4)            # explicit scoped-VMEM limit
    budget = int(vmem_limit * 0.8)
    per_elem = (
        2 * (H * (v_len + k_len + q_len) * D * mm_b      # double-buffered q/k/v
             + H * q_len * k_len                         # int8 mask block
             + q_len * E * out_b)                        # output block
        + 2 * H * D * E * mm_b                           # tb-scaled fc weight
        + 4 * (3 * H * (v_len + q_len) * D               # f32 projections
               + 3 * H * q_len * k_len                   # energy / p / att
               + 2 * H * q_len * D                       # head outputs
               + 2 * H * q_len * E                       # fc partials
               + q_len * E))                             # final block
    fixed = 2 * (3 * D * D * mm_b + E * 4) + (2 << 20)   # weights + bias + slack
    tb = _pick_batch_tile(N, per_elem, fixed, budget, num_tc)
    grid = (N // tb,)
    tbh = tb * H

    # fc_out weight pre-tiled per fused (batch, head) row of one tile:
    # wo_tiled[z] == W_fc.T[(z % H)*D : (z % H + 1)*D, :]
    wo_tiled = jnp.tile(params["w_fc"].T.reshape(H, D, E).astype(matmul_dtype),
                        (tb, 1, 1))                                  # (tb*H,D,E)

    # Advisory cost estimate so XLA can schedule the surrounding layout prep
    # around the kernel instead of serializing on it.
    Z = N * H
    flops = (2 * Z * (v_len + k_len + q_len) * D * D       # projections
             + 2 * Z * q_len * k_len * D * 2               # QK^T and PV
             + 2 * Z * q_len * D * E)                      # fc fold
    bytes_accessed = ((vz.size + kz.size + qz.size) * mm_b + mask_i8.size
                      + 3 * D * D * mm_b + tbh * D * E * mm_b + E * 4
                      + N * q_len * E * out_b)
    cost = pl.CostEstimate(flops=int(flops),
                           transcendentals=int(Z * q_len * k_len),
                           bytes_accessed=int(bytes_accessed))

    kernel = make_self_attention_kernel(
        E, H, (v_len, k_len, q_len), tb, matmul_dtype, approx_reciprocal)

    out = pl.pallas_call(
        kernel,
        out_shape=jax.ShapeDtypeStruct((N, q_len, E), out_dtype),
        grid_spec=pltpu.PrefetchScalarGridSpec(
            num_scalar_prefetch=0,
            grid=grid,
            in_specs=[
                pl.BlockSpec((tbh, v_len, D), lambda n: (n, 0, 0)),
                pl.BlockSpec((tbh, k_len, D), lambda n: (n, 0, 0)),
                pl.BlockSpec((tbh, q_len, D), lambda n: (n, 0, 0)),
                pl.BlockSpec((tbh, q_len, k_len), lambda n: (n, 0, 0)),
                pl.BlockSpec((D, D), lambda n: (0, 0)),
                pl.BlockSpec((D, D), lambda n: (0, 0)),
                pl.BlockSpec((D, D), lambda n: (0, 0)),
                pl.BlockSpec((tbh, D, E), lambda n: (0, 0, 0)),
                pl.BlockSpec((1, E), lambda n: (0, 0)),
            ],
            out_specs=pl.BlockSpec((tb, q_len, E), lambda n: (n, 0, 0)),
        ),
        compiler_params=pltpu.CompilerParams(
            dimension_semantics=("parallel",),
            vmem_limit_bytes=vmem_limit),
        cost_estimate=cost,
    )(vz, kz, qz, mask_i8, wv_t, wk_t, wq_t, wo_tiled, b_fc)

    return out


def reference_forward(values, keys, query, mask, params):
    # Pure-JAX (f32) mirror of the PyTorch forward, for correctness checking.
    N, q_len, E = query.shape
    H = params["heads"]
    D = E // H
    v = values.reshape(N, -1, H, D)
    k = keys.reshape(N, -1, H, D)
    q = query.reshape(N, q_len, H, D)
    v = jnp.einsum("nlhd,od->nlho", v, params["w_values"])
    k = jnp.einsum("nlhd,od->nlho", k, params["w_keys"])
    q = jnp.einsum("nlhd,od->nlho", q, params["w_query"])
    energy = jnp.einsum("nqhd,nkhd->nhqk", q, k)
    energy = jnp.where(mask == 1, jnp.float32(-1e20), energy)
    attention = jax.nn.softmax(energy / (E ** 0.5), axis=3)
    out = jnp.einsum("nhql,nlhd->nqhd", attention, v)
    out = out.reshape(N, q_len, H * D)
    out = out @ params["w_fc"].T + params["b_fc"][0]
    return out


if __name__ == "__main__":
    # Small shapes consistent with the module.
    N = 2           # batch
    seq = 8         # value_len == key_len == query_len
    embed_size = 32
    heads = 4
    head_dim = embed_size // heads

    key = jax.random.PRNGKey(0)
    ks = jax.random.split(key, 8)

    values = jax.random.normal(ks[0], (N, seq, embed_size), jnp.float32)
    keys_in = jax.random.normal(ks[1], (N, seq, embed_size), jnp.float32)
    query = jax.random.normal(ks[2], (N, seq, embed_size), jnp.float32)

    # Causal-style mask: 1 where key index > query index (positions to block),
    # plus one fully-masked query row to exercise the module's "uniform
    # attention for fully-masked rows" behavior.
    causal = (jnp.arange(seq)[None, :] > jnp.arange(seq)[:, None]).astype(jnp.int32)
    mask = jnp.broadcast_to(causal, (N, heads, seq, seq))
    mask = mask.at[1, 2, 3, :].set(1)
    inverse_mask = 1 - mask  # unused by the forward, passed for API parity

    params = {
        "heads": heads,
        "w_values": 0.1 * jax.random.normal(ks[3], (head_dim, head_dim), jnp.float32),
        "w_keys":   0.1 * jax.random.normal(ks[4], (head_dim, head_dim), jnp.float32),
        "w_query":  0.1 * jax.random.normal(ks[5], (head_dim, head_dim), jnp.float32),
        "w_fc":     0.1 * jax.random.normal(ks[6], (embed_size, embed_size), jnp.float32),
        "b_fc":     0.1 * jax.random.normal(ks[7], (1, embed_size), jnp.float32),
    }

    out = self_attention_forward(values, keys_in, query, mask, inverse_mask, params)
    out = jax.block_until_ready(out)

    ref = reference_forward(values, keys_in, query, mask, params)
    assert out.shape == (N, seq, embed_size)
    err = jnp.max(jnp.abs(out - ref))
    # Tolerance covers bf16 MXU operands and the approximate EUP reciprocal
    # used for the softmax denominator; accumulation stays in f32.
    assert jnp.allclose(out, ref, rtol=3e-2, atol=3e-2), f"max abs err = {err}"

    print("KERNEL_OK")
</pallas_src>

<mosaic_0001>
module attributes {stable_mosaic.version = 11 : i64} {
  func.func @kernel(%arg0: i32, %arg1: memref<8x8x8xbf16, #tpu.memory_space<vmem>>, %arg2: memref<8x8x8xbf16, #tpu.memory_space<vmem>>, %arg3: memref<8x8x8xbf16, #tpu.memory_space<vmem>>, %arg4: memref<8x8x8xi8, #tpu.memory_space<vmem>>, %arg5: memref<8x8xbf16, #tpu.memory_space<vmem>>, %arg6: memref<8x8xbf16, #tpu.memory_space<vmem>>, %arg7: memref<8x8xbf16, #tpu.memory_space<vmem>>, %arg8: memref<8x8x32xbf16, #tpu.memory_space<vmem>>, %arg9: memref<1x32xf32, #tpu.memory_space<vmem>>, %arg10: memref<2x8x32xf32, #tpu.memory_space<vmem>>) attributes {dimension_semantics = [#tpu.dimension_semantics<parallel>], iteration_bounds = array<i64: 1>, scalar_prefetch = 0 : i64, scratch_operands = 0 : i64, tpu.core_type = #tpu.core_type<tc>, window_params = [{transform_indices = @transform_0, window_bounds = array<i64: 8, 8, 8>}, {transform_indices = @transform_1, window_bounds = array<i64: 8, 8, 8>}, {transform_indices = @transform_2, window_bounds = array<i64: 8, 8, 8>}, {transform_indices = @transform_3, window_bounds = array<i64: 8, 8, 8>}, {pipeline_mode = #tpu.pipeline_mode<synchronous>, transform_indices = @transform_4, window_bounds = array<i64: 8, 8>}, {pipeline_mode = #tpu.pipeline_mode<synchronous>, transform_indices = @transform_5, window_bounds = array<i64: 8, 8>}, {pipeline_mode = #tpu.pipeline_mode<synchronous>, transform_indices = @transform_6, window_bounds = array<i64: 8, 8>}, {pipeline_mode = #tpu.pipeline_mode<synchronous>, transform_indices = @transform_7, window_bounds = array<i64: 8, 8, 32>}, {pipeline_mode = #tpu.pipeline_mode<synchronous>, transform_indices = @transform_8, window_bounds = array<i64: 1, 32>}, {transform_indices = @transform_9, window_bounds = array<i64: 2, 8, 32>}]} {
    %c0 = arith.constant 0 : index
    %c0_0 = arith.constant 0 : index
    %c0_1 = arith.constant 0 : index
    %0 = vector.load %arg1[%c0, %c0_0, %c0_1] : memref<8x8x8xbf16, #tpu.memory_space<vmem>>, vector<8x8x8xbf16>
    %1 = vector.shape_cast %0 : vector<8x8x8xbf16> to vector<64x8xbf16>
    %c0_2 = arith.constant 0 : index
    %c0_3 = arith.constant 0 : index
    %2 = vector.load %arg5[%c0_2, %c0_3] : memref<8x8xbf16, #tpu.memory_space<vmem>>, vector<8x8xbf16>
    %cst = arith.constant dense<0.000000e+00> : vector<64x8xf32>
    %3 = tpu.matmul %1, %2, %cst {dimension_numbers = #tpu.dot_dimension_numbers<[1], [0], [0], [1], [0, 0, 1, 1], [], []>} : vector<64x8xbf16>, vector<8x8xbf16>, vector<64x8xf32> -> vector<64x8xf32>
    %c0_4 = arith.constant 0 : index
    %c0_5 = arith.constant 0 : index
    %c0_6 = arith.constant 0 : index
    %4 = vector.load %arg2[%c0_4, %c0_5, %c0_6] : memref<8x8x8xbf16, #tpu.memory_space<vmem>>, vector<8x8x8xbf16>
    %5 = vector.shape_cast %4 : vector<8x8x8xbf16> to vector<64x8xbf16>
    %c0_7 = arith.constant 0 : index
    %c0_8 = arith.constant 0 : index
    %6 = vector.load %arg6[%c0_7, %c0_8] : memref<8x8xbf16, #tpu.memory_space<vmem>>, vector<8x8xbf16>
    %cst_9 = arith.constant dense<0.000000e+00> : vector<64x8xf32>
    %7 = tpu.matmul %5, %6, %cst_9 {dimension_numbers = #tpu.dot_dimension_numbers<[1], [0], [0], [1], [0, 0, 1, 1], [], []>} : vector<64x8xbf16>, vector<8x8xbf16>, vector<64x8xf32> -> vector<64x8xf32>
    %c0_10 = arith.constant 0 : index
    %c0_11 = arith.constant 0 : index
    %c0_12 = arith.constant 0 : index
    %8 = vector.load %arg3[%c0_10, %c0_11, %c0_12] : memref<8x8x8xbf16, #tpu.memory_space<vmem>>, vector<8x8x8xbf16>
    %9 = vector.shape_cast %8 : vector<8x8x8xbf16> to vector<64x8xbf16>
    %c0_13 = arith.constant 0 : index
    %c0_14 = arith.constant 0 : index
    %10 = vector.load %arg7[%c0_13, %c0_14] : memref<8x8xbf16, #tpu.memory_space<vmem>>, vector<8x8xbf16>
    %cst_15 = arith.constant dense<0.000000e+00> : vector<64x8xf32>
    %11 = tpu.matmul %9, %10, %cst_15 {dimension_numbers = #tpu.dot_dimension_numbers<[1], [0], [0], [1], [0, 0, 1, 1], [], []>} : vector<64x8xbf16>, vector<8x8xbf16>, vector<64x8xf32> -> vector<64x8xf32>
    %12 = vector.shape_cast %11 : vector<64x8xf32> to vector<8x8x8xf32>
    %13 = arith.truncf %12 : vector<8x8x8xf32> to vector<8x8x8xbf16>
    %14 = vector.shape_cast %7 : vector<64x8xf32> to vector<8x8x8xf32>
    %15 = arith.truncf %14 : vector<8x8x8xf32> to vector<8x8x8xbf16>
    %16 = vector.shape_cast %3 : vector<64x8xf32> to vector<8x8x8xf32>
    %17 = arith.truncf %16 : vector<8x8x8xf32> to vector<8x8x8xbf16>
    "tpu.trace_start"() <{level = 10 : i32, message = "zqd,zkd->zqk"}> : () -> ()
    %cst_16 = arith.constant dense<0.000000e+00> : vector<8x8x8xf32>
    %18 = tpu.matmul %13, %15, %cst_16 {dimension_numbers = #tpu.dot_dimension_numbers<[2], [2], [1], [1], [0, 0, 0, 1, 1, 1], [0], [0]>} : vector<8x8x8xbf16>, vector<8x8x8xbf16>, vector<8x8x8xf32> -> vector<8x8x8xf32>
    "tpu.trace_stop"() : () -> ()
    %c0_17 = arith.constant 0 : index
    %c0_18 = arith.constant 0 : index
    %c0_19 = arith.constant 0 : index
    %19 = vector.load %arg4[%c0_17, %c0_18, %c0_19] : memref<8x8x8xi8, #tpu.memory_space<vmem>>, vector<8x8x8xi8>
    %20 = arith.sitofp %19 : vector<8x8x8xi8> to vector<8x8x8xf32>
    %cst_20 = arith.constant 1.000000e+00 : f32
    %21 = vector.broadcast %cst_20 : f32 to vector<8x8x8xf32>
    %22 = arith.cmpf oeq, %20, %21 : vector<8x8x8xf32>
    %cst_21 = arith.constant -1.000000e+20 : f32
    %23 = vector.broadcast %cst_21 : f32 to vector<8x8x8xf32>
    %24 = arith.select %22, %23, %18 : vector<8x8x8xi1>, vector<8x8x8xf32>
    %cst_22 = arith.constant dense<0xFF800000> : vector<8x8xf32>
    %25 = vector.multi_reduction <maximumf>, %24, %cst_22 [2] : vector<8x8x8xf32> to vector<8x8xf32>
    %26 = vector.shape_cast %25 : vector<8x8xf32> to vector<8x8x1xf32>
    %27 = vector.broadcast %26 : vector<8x8x1xf32> to vector<8x8x8xf32>
    %28 = arith.subf %24, %27 : vector<8x8x8xf32>
    %29 = math.exp %28 : vector<8x8x8xf32>
    %cst_23 = arith.constant dense<0.000000e+00> : vector<8x8xf32>
    %30 = vector.multi_reduction <add>, %29, %cst_23 [2] : vector<8x8x8xf32> to vector<8x8xf32>
    %31 = vector.shape_cast %30 : vector<8x8xf32> to vector<8x8x1xf32>
    %32 = tpu.reciprocal %31 {approx = true} : vector<8x8x1xf32> -> vector<8x8x1xf32>
    %33 = vector.broadcast %32 : vector<8x8x1xf32> to vector<8x8x8xf32>
    %34 = arith.mulf %29, %33 : vector<8x8x8xf32>
    %35 = arith.truncf %34 : vector<8x8x8xf32> to vector<8x8x8xbf16>
    "tpu.trace_start"() <{level = 10 : i32, message = "zqk,zkd->zqd"}> : () -> ()
    %cst_24 = arith.constant dense<0.000000e+00> : vector<8x8x8xf32>
    %36 = tpu.matmul %35, %17, %cst_24 {dimension_numbers = #tpu.dot_dimension_numbers<[2], [1], [1], [2], [0, 0, 0, 1, 1, 2], [0], [0]>} : vector<8x8x8xbf16>, vector<8x8x8xbf16>, vector<8x8x8xf32> -> vector<8x8x8xf32>
    "tpu.trace_stop"() : () -> ()
    %37 = arith.truncf %36 : vector<8x8x8xf32> to vector<8x8x8xbf16>
    %c0_25 = arith.constant 0 : index
    %c0_26 = arith.constant 0 : index
    %c0_27 = arith.constant 0 : index
    %38 = vector.load %arg8[%c0_25, %c0_26, %c0_27] : memref<8x8x32xbf16, #tpu.memory_space<vmem>>, vector<8x8x32xbf16>
    "tpu.trace_start"() <{level = 10 : i32, message = "zqd,zde->zqe"}> : () -> ()
    %cst_28 = arith.constant dense<0.000000e+00> : vector<8x8x32xf32>
    %39 = tpu.matmul %37, %38, %cst_28 {dimension_numbers = #tpu.dot_dimension_numbers<[2], [1], [1], [2], [0, 0, 0, 1, 1, 2], [0], [0]>} : vector<8x8x8xbf16>, vector<8x8x32xbf16>, vector<8x8x32xf32> -> vector<8x8x32xf32>
    "tpu.trace_stop"() : () -> ()
    %40 = vector.shape_cast %39 : vector<8x8x32xf32> to vector<2x4x8x32xf32>
    %cst_29 = arith.constant dense<0.000000e+00> : vector<2x8x32xf32>
    %41 = vector.multi_reduction <add>, %40, %cst_29 [1] : vector<2x4x8x32xf32> to vector<2x8x32xf32>
    %c0_30 = arith.constant 0 : index
    %c0_31 = arith.constant 0 : index
    %42 = vector.load %arg9[%c0_30, %c0_31] : memref<1x32xf32, #tpu.memory_space<vmem>>, vector<1x32xf32>
    %43 = vector.shape_cast %42 : vector<1x32xf32> to vector<1x1x32xf32>
    %44 = vector.broadcast %43 : vector<1x1x32xf32> to vector<2x8x32xf32>
    %45 = arith.addf %41, %44 : vector<2x8x32xf32>
    %c0_32 = arith.constant 0 : index
    %c0_33 = arith.constant 0 : index
    %c0_34 = arith.constant 0 : index
    %46 = vector.load %arg10[%c0_32, %c0_33, %c0_34] : memref<2x8x32xf32, #tpu.memory_space<vmem>>, vector<2x8x32xf32>
    tpu.vector_store %arg10[%c0_32, %c0_33, %c0_34], %45 {strides = array<i32>} : memref<2x8x32xf32, #tpu.memory_space<vmem>>, vector<2x8x32xf32>,
    return
  }
  func.func @transform_0(%arg0: i32) -> (i32, i32, i32) {
    %c0_i32 = arith.constant 0 : i32
    %c0_i32_0 = arith.constant 0 : i32
    %c0_i32_1 = arith.constant 0 : i32
    return %arg0, %c0_i32, %c0_i32_0 : i32, i32, i32
  }
  func.func @transform_1(%arg0: i32) -> (i32, i32, i32) {
    %c0_i32 = arith.constant 0 : i32
    %c0_i32_0 = arith.constant 0 : i32
    %c0_i32_1 = arith.constant 0 : i32
    return %arg0, %c0_i32, %c0_i32_0 : i32, i32, i32
  }
  func.func @transform_2(%arg0: i32) -> (i32, i32, i32) {
    %c0_i32 = arith.constant 0 : i32
    %c0_i32_0 = arith.constant 0 : i32
    %c0_i32_1 = arith.constant 0 : i32
    return %arg0, %c0_i32, %c0_i32_0 : i32, i32, i32
  }
  func.func @transform_3(%arg0: i32) -> (i32, i32, i32) {
    %c0_i32 = arith.constant 0 : i32
    %c0_i32_0 = arith.constant 0 : i32
    %c0_i32_1 = arith.constant 0 : i32
    return %arg0, %c0_i32, %c0_i32_0 : i32, i32, i32
  }
  func.func @transform_4(%arg0: i32) -> (i32, i32) {
    %c0_i32 = arith.constant 0 : i32
    %c0_i32_0 = arith.constant 0 : i32
    %c0_i32_1 = arith.constant 0 : i32
    return %c0_i32, %c0_i32_0 : i32, i32
  }
  func.func @transform_5(%arg0: i32) -> (i32, i32) {
    %c0_i32 = arith.constant 0 : i32
    %c0_i32_0 = arith.constant 0 : i32
    %c0_i32_1 = arith.constant 0 : i32
    return %c0_i32, %c0_i32_0 : i32, i32
  }
  func.func @transform_6(%arg0: i32) -> (i32, i32) {
    %c0_i32 = arith.constant 0 : i32
    %c0_i32_0 = arith.constant 0 : i32
    %c0_i32_1 = arith.constant 0 : i32
    return %c0_i32, %c0_i32_0 : i32, i32
  }
  func.func @transform_7(%arg0: i32) -> (i32, i32, i32) {
    %c0_i32 = arith.constant 0 : i32
    %c0_i32_0 = arith.constant 0 : i32
    %c0_i32_1 = arith.constant 0 : i32
    %c0_i32_2 = arith.constant 0 : i32
    return %c0_i32, %c0_i32_0, %c0_i32_1 : i32, i32, i32
  }
  func.func @transform_8(%arg0: i32) -> (i32, i32) {
    %c0_i32 = arith.constant 0 : i32
    %c0_i32_0 = arith.constant 0 : i32
    %c0_i32_1 = arith.constant 0 : i32
    return %c0_i32, %c0_i32_0 : i32, i32
  }
  func.func @transform_9(%arg0: i32) -> (i32, i32, i32) {
    %c0_i32 = arith.constant 0 : i32
    %c0_i32_0 = arith.constant 0 : i32
    %c0_i32_1 = arith.constant 0 : i32
    return %arg0, %c0_i32, %c0_i32_0 : i32, i32, i32
  }
}

</mosaic_0001>

<bundles_post_ra>
// kernel: tpu_custom_call.1
= control target key start
LH: loop header
LB: loop body
LE: loop exit
PB: predicated region body
PF: predicated region fallthrough
CT: control target
= control target key end

     0   :  { %14 = vsyncpa [#allocation3], 0  ;;  %s2853_s0 = inlined_call_operand.hbm [shape: bf16[8,8,8], index: 0, kind: input, shape index: {}]   ;;  %s2854_s1 = inlined_call_operand.hbm [shape: bf16[8,8,8], index: 1, kind: input, shape index: {}]   ;;  %s2855_s2 = inlined_call_operand.hbm [shape: bf16[8,8,8], index: 2, kind: input, shape index: {}]   ;;  %s2856_s3 = inlined_call_operand.hbm [shape: s8[8,8,8], index: 3, kind: input, shape index: {}]   ;;  %s2857_s4 = inlined_call_operand.hbm [shape: bf16[8,8], index: 4, kind: input, shape index: {}]   ;;  %s2858_s5 = inlined_call_operand.hbm [shape: bf16[8,8], index: 5, kind: input, shape index: {}]   ;;  %s2859_s6 = inlined_call_operand.hbm [shape: bf16[8,8], index: 6, kind: input, shape index: {}]   ;;  %s2860_s7 = inlined_call_operand.hbm [shape: bf16[8,8,32], index: 7, kind: input, shape index: {}]   ;;  %s2861_s8 = inlined_call_operand.hbm [shape: f32[1,32], index: 8, kind: input, shape index: {}]   ;;  %s2862_s9 = inlined_call_operand.hbm [shape: f32[2,8,32], index: 9, kind: output, shape index: {}]  }
   0x1   :  { %15 = vsyncpa [#allocation6], 0 }
   0x2   :  { %16 = vsyncpa [#allocation9], 0 }
   0x3   :  { %17 = vsyncpa [#allocation12], 0 }
   0x4   :  { %18 = vsyncpa [#allocation15], 0 }
   0x5   :  { %19 = vsyncpa [#allocation4], 0  ;;  %s2406_s30 = smov [#allocation5]   ;;  %s2407_s11 = smov [#allocation8]  }
   0x6   :  { %s37_s10 = sshll.u32 %s2406_s30, 4  ;;  %s61_s12 = sshll.u32 %s2407_s11, 4  ;;  %s38_s10 = int_to_ptr.vmem [resolvable:$true] %s37_s10  ;;  %s2474_s12 = int_to_ptr.vmem [resolvable:$true] %s61_s12 }
   0x7   :  { %s2174_s15 = scalar_lea.hbm %s2854_s1, 512 }
   0x8   :  { %p2175_p0 = scmp.ne.s32.totalorder %s2854_s1, %s2174_s15  ;;  %p2178_p1 = scmp.lt.u32.totalorder %s2174_s15, %s2854_s1 }
   0xa   :  { %p2180_p2 = pnand %p2178_p1, %p2175_p0 }
   0xc   :  { %2183 = shalt.err (!%p2180_p2)
}
   0xd   :  { %s2184_s20 = scalar_lea.vmem %s38_s10, 512  ;;  %p2189_p4 = scmp.lt.s32.totalorder %s38_s10, %s38_s10 }
   0xe   :  { %p2185_p3 = scmp.ne.s32.totalorder %s38_s10, %s2184_s20  ;;  %p2190_p5 = scmp.lt.s32.totalorder %s2184_s20, %s2184_s20 }
  0x10   :  { %p2191_p6 = por %p2190_p5, %p2189_p4 }
  0x12   :  { %p2192_p7 = pnand %p2191_p6, %p2185_p3 }
  0x14   :  { %2195 = shalt.err (!%p2192_p7)
}
  0x15   :  { %s2408_s21 = smov 64   ;;  %s2409_s22 = smov 4  }
  0x16   :  { %43 = dma.hbm_to_vmem [thread:$0]  %s2854_s1, 512, %s38_s10, [#allocation6], %s2408_s21, %s2408_s21, %s2409_s22  }
  0x17   :  { %s2196_s27 = scalar_lea.hbm %s2856_s3, 256 }
  0x18   :  { %p2197_p8 = scmp.ne.s32.totalorder %s2856_s3, %s2196_s27  ;;  %p2200_p9 = scmp.lt.u32.totalorder %s2196_s27, %s2856_s3 }
  0x1a   :  { %p2202_p10 = pnand %p2200_p9, %p2197_p8 }
  0x1c   :  { %2205 = shalt.err (!%p2202_p10)
}
  0x1d   :  { %s2206_s13 = scalar_lea.vmem %s2474_s12, 256  ;;  %p2211_p12 = scmp.lt.s32.totalorder %s2474_s12, %s2474_s12 }
  0x1e   :  { %p2207_p11 = scmp.ne.s32.totalorder %s2474_s12, %s2206_s13  ;;  %p2212_p13 = scmp.lt.s32.totalorder %s2206_s13, %s2206_s13 }
  0x20   :  { %p2213_p0 = por %p2212_p13, %p2211_p12 }
  0x22   :  { %p2214_p1 = pnand %p2213_p0, %p2207_p11 }
  0x24   :  { %2217 = shalt.err (!%p2214_p1)
}
  0x25   :  { %s2410_s1 = smov 32   ;;  %s2411_s10 = smov 2  }
  0x26   :  { %67 = dma.hbm_to_vmem [thread:$0]  %s2856_s3, 256, %s2474_s12, [#allocation9], %s2410_s1, %s2410_s1, %s2411_s10  }
  0x27   :  { %s2412_s16 = smov [#allocation11]   ;;  %s2413_s18 = smov [#allocation14]  }
  0x28   :  { %s84_s17 = sshll.u32 %s2412_s16, 4  ;;  %s103_s19 = sshll.u32 %s2413_s18, 4  ;;  %s85_s17 = int_to_ptr.vmem [resolvable:$true] %s84_s17  ;;  %s2508_s19 = int_to_ptr.vmem [resolvable:$true] %s103_s19 }
  0x29   :  { %s2218_s24 = scalar_lea.hbm %s2858_s5, 64 }
  0x2a   :  { %p2219_p2 = scmp.ne.s32.totalorder %s2858_s5, %s2218_s24  ;;  %p2222_p3 = scmp.lt.u32.totalorder %s2218_s24, %s2858_s5 }
  0x2c   :  { %p2224_p4 = pnand %p2222_p3, %p2219_p2 }
  0x2e   :  { %2227 = shalt.err (!%p2224_p4)
}
  0x2f   :  { %s2228_s3 = scalar_lea.vmem %s85_s17, 64  ;;  %p2233_p6 = scmp.lt.s32.totalorder %s85_s17, %s85_s17 }
  0x30   :  { %p2229_p5 = scmp.ne.s32.totalorder %s85_s17, %s2228_s3  ;;  %p2234_p7 = scmp.lt.s32.totalorder %s2228_s3, %s2228_s3 }
  0x32   :  { %p2235_p8 = por %p2234_p7, %p2233_p6 }
  0x34   :  { %p2236_p9 = pnand %p2235_p8, %p2229_p5 }
  0x36   :  { %2239 = shalt.err (!%p2236_p9)
}
  0x37   :  { %87 = dma.hbm_to_vmem [thread:$0]  %s2858_s5, 64, %s85_s17, [#allocation12]  }
  0x38   :  { %s2240_s13 = scalar_lea.hbm %s2860_s7, 512 }
  0x39   :  { %p2241_p10 = scmp.ne.s32.totalorder %s2860_s7, %s2240_s13  ;;  %p2244_p11 = scmp.lt.u32.totalorder %s2240_s13, %s2860_s7 }
  0x3b   :  { %p2246_p12 = pnand %p2244_p11, %p2241_p10 }
  0x3d   :  { %2249 = shalt.err (!%p2246_p12)
}
  0x3e   :  { %s2250_s16 = scalar_lea.vmem %s2508_s19, 512  ;;  %p2255_p0 = scmp.lt.s32.totalorder %s2508_s19, %s2508_s19 }
  0x3f   :  { %p2251_p13 = scmp.ne.s32.totalorder %s2508_s19, %s2250_s16  ;;  %p2256_p1 = scmp.lt.s32.totalorder %s2250_s16, %s2250_s16 }
  0x41   :  { %p2257_p2 = por %p2256_p1, %p2255_p0 }
  0x43   :  { %p2258_p3 = pnand %p2257_p2, %p2251_p13 }
  0x45   :  { %2261 = shalt.err (!%p2258_p3)
}
  0x46   :  { %109 = dma.hbm_to_vmem [thread:$0]  %s2860_s7, 512, %s2508_s19, [#allocation15], %s2408_s21, %s2408_s21, %s2409_s22  }
  0x47   :  { %s2414_s18 = smov [#allocation2]   ;;  %s2415_s23 = smov [#allocation7]  }
  0x48   :  { %s25_s20 = sshll.u32 %s2414_s18, 4  ;;  %s49_s24 = sshll.u32 %s2415_s23, 4  ;;  %s26_s20 = int_to_ptr.vmem [resolvable:$true] %s25_s20  ;;  %s2542_s24 = int_to_ptr.vmem [resolvable:$true] %s49_s24 }
  0x49   :  { %s2262_s27 = scalar_lea.hbm %s2853_s0, 512 }
  0x4a   :  { %p2263_p4 = scmp.ne.s32.totalorder %s2853_s0, %s2262_s27  ;;  %p2266_p5 = scmp.lt.u32.totalorder %s2262_s27, %s2853_s0 }
  0x4c   :  { %p2268_p6 = pnand %p2266_p5, %p2263_p4 }
  0x4e   :  { %2271 = shalt.err (!%p2268_p6)
}
  0x4f   :  { %s2272_s7 = scalar_lea.vmem %s26_s20, 512  ;;  %p2277_p8 = scmp.lt.s32.totalorder %s26_s20, %s26_s20 }
  0x50   :  { %p2273_p7 = scmp.ne.s32.totalorder %s26_s20, %s2272_s7  ;;  %p2278_p9 = scmp.lt.s32.totalorder %s2272_s7, %s2272_s7 }
  0x52   :  { %p2279_p10 = por %p2278_p9, %p2277_p8 }
  0x54   :  { %p2280_p11 = pnand %p2279_p10, %p2273_p7 }
  0x56   :  { %2283 = shalt.err (!%p2280_p11)
}
  0x57   :  { %31 = dma.hbm_to_vmem [thread:$0]  %s2853_s0, 512, %s26_s20, [#allocation3], %s2408_s21, %s2408_s21, %s2409_s22  }
  0x58   :  { %s2284_s1 = scalar_lea.hbm %s2855_s2, 512 }
  0x59   :  { %p2285_p12 = scmp.ne.s32.totalorder %s2855_s2, %s2284_s1  ;;  %p2288_p13 = scmp.lt.u32.totalorder %s2284_s1, %s2855_s2 }
  0x5b   :  { %p2290_p0 = pnand %p2288_p13, %p2285_p12 }
  0x5d   :  { %2293 = shalt.err (!%p2290_p0)
}
  0x5e   :  { %s2294_s5 = scalar_lea.vmem %s2542_s24, 512  ;;  %p2299_p2 = scmp.lt.s32.totalorder %s2542_s24, %s2542_s24 }
  0x5f   :  { %p2295_p1 = scmp.ne.s32.totalorder %s2542_s24, %s2294_s5  ;;  %p2300_p3 = scmp.lt.s32.totalorder %s2294_s5, %s2294_s5 }
  0x61   :  { %p2301_p4 = por %p2300_p3, %p2299_p2 }
  0x63   :  { %p2302_p5 = pnand %p2301_p4, %p2295_p1 }
  0x65   :  { %2305 = shalt.err (!%p2302_p5)
}
  0x66   :  { %55 = dma.hbm_to_vmem [thread:$0]  %s2855_s2, 512, %s2542_s24, [#allocation6], %s2408_s21, %s2408_s21, %s2409_s22  }
  0x67   :  { %s2416_s18 = smov [#allocation10]   ;;  %s2417_s23 = smov [#allocation13]  }
  0x68   :  { %s74_s20 = sshll.u32 %s2416_s18, 4  ;;  %s94_s25 = sshll.u32 %s2417_s23, 4  ;;  %s75_s20 = int_to_ptr.vmem [resolvable:$true] %s74_s20  ;;  %s95_s25 = int_to_ptr.vmem [resolvable:$true] %s94_s25 }
  0x69   :  { %s2306_s28 = scalar_lea.hbm %s2857_s4, 64 }
  0x6a   :  { %p2307_p6 = scmp.ne.s32.totalorder %s2857_s4, %s2306_s28  ;;  %p2310_p7 = scmp.lt.u32.totalorder %s2306_s28, %s2857_s4 }
  0x6c   :  { %p2312_p8 = pnand %p2310_p7, %p2307_p6 }
  0x6e   :  { %2315 = shalt.err (!%p2312_p8)
}
  0x6f   :  { %s2316_s2 = scalar_lea.vmem %s75_s20, 64  ;;  %p2321_p10 = scmp.lt.s32.totalorder %s75_s20, %s75_s20 }
  0x70   :  { %p2317_p9 = scmp.ne.s32.totalorder %s75_s20, %s2316_s2  ;;  %p2322_p11 = scmp.lt.s32.totalorder %s2316_s2, %s2316_s2 }
  0x72   :  { %p2323_p12 = por %p2322_p11, %p2321_p10 }
  0x74   :  { %p2324_p13 = pnand %p2323_p12, %p2317_p9 }
  0x76   :  { %2327 = shalt.err (!%p2324_p13)
}
  0x77   :  { %77 = dma.hbm_to_vmem [thread:$0]  %s2857_s4, 64, %s75_s20, [#allocation9]  }
  0x78   :  { %s2328_s30 = scalar_lea.hbm %s2859_s6, 64 }
  0x79   :  { %p2329_p0 = scmp.ne.s32.totalorder %s2859_s6, %s2328_s30  ;;  %p2332_p1 = scmp.lt.u32.totalorder %s2328_s30, %s2859_s6 }
  0x7b   :  { %p2334_p2 = pnand %p2332_p1, %p2329_p0 }
  0x7d   :  { %2337 = shalt.err (!%p2334_p2)
}
  0x7e   :  { %s2338_s14 = scalar_lea.vmem %s95_s25, 64  ;;  %p2343_p4 = scmp.lt.s32.totalorder %s95_s25, %s95_s25 }
  0x7f   :  { %p2339_p3 = scmp.ne.s32.totalorder %s95_s25, %s2338_s14  ;;  %p2344_p5 = scmp.lt.s32.totalorder %s2338_s14, %s2338_s14 }
  0x81   :  { %p2345_p6 = por %p2344_p5, %p2343_p4 }
  0x83   :  { %p2346_p7 = pnand %p2345_p6, %p2339_p3 }
  0x85   :  { %2349 = shalt.err (!%p2346_p7)
}
  0x86   :  { %97 = dma.hbm_to_vmem [thread:$0]  %s2859_s6, 64, %s95_s25, [#allocation12]  }
  0x87   :  { %s2418_s16 = smov [#allocation16]   ;;  %s2350_s18 = scalar_lea.hbm %s2861_s8, 16 }
  0x88   :  { %s116_s5 = sshll.u32 %s2418_s16, 4  ;;  %p2351_p8 = scmp.ne.s32.totalorder %s2861_s8, %s2350_s18  ;;  %s117_s5 = int_to_ptr.vmem [resolvable:$true] %s116_s5 }
  0x89   :  { %p2354_p9 = scmp.lt.u32.totalorder %s2350_s18, %s2861_s8 }
  0x8b   :  { %p2356_p10 = pnand %p2354_p9, %p2351_p8 }
  0x8d   :  { %2359 = shalt.err (!%p2356_p10)
}
  0x8e   :  { %s2360_s28 = scalar_lea.vmem %s117_s5, 16  ;;  %s2364_s6 = scalar_lea.vmem %s117_s5, 32 }
  0x8f   :  { %p2361_p11 = scmp.ne.s32.totalorder %s117_s5, %s2360_s28  ;;  %p2365_p12 = scmp.lt.s32.totalorder %s117_s5, %s117_s5 }
  0x90   :  { %p2366_p13 = scmp.lt.s32.totalorder %s2364_s6, %s2360_s28 }
  0x92   :  { %p2367_p0 = por %p2366_p13, %p2365_p12 }
  0x94   :  { %p2368_p1 = pnand %p2367_p0, %p2361_p11 }
  0x96   :  { %2371 = shalt.err (!%p2368_p1)
}
  0x97   :  { %119 = dma.hbm_to_vmem [thread:$0]  %s2861_s8, 16, %s117_s5, [#allocation15]  }
  0x98   :  { %2394 = dma.done.wait [#allocation3], 512  }
  0x99   :  { %2395 = vsyncadd [#allocation3], 4294966784 }
  0x9a   :  { %2396 = dma.done.wait [#allocation6], 1024  }
  0x9b   :  { %2397 = vsyncadd [#allocation6], 4294966272 }
  0x9c   :  { %2398 = dma.done.wait [#allocation9], 320  }
  0x9d   :  { %2399 = vsyncadd [#allocation9], 4294966976 }
  0x9e   :  { %2400 = dma.done.wait [#allocation12], 128  }
  0x9f   :  { %2401 = vsyncadd [#allocation12], 4294967168 }
  0xa0   :  { %2402 = dma.done.wait [#allocation15], 528  }
  0xa1   :  { %2403 = vsyncadd [#allocation15], 4294966768  ;;  %vm190_vm0 = vcmask 1043456   ;;  %vm177_vm1 = vcmask 64512   ;;  %v156_v0 = vld [vmem:[#allocation10] sm:$0xf] }
  0xa2   :  { %v267_v1 = vld [vmem:[#allocation11] sm:$0xf]  ;;  %2106 = vmatprep.subr.msk.bf16.mxu0 %vm190_vm0, %v156_v0  ;;  %v192_v2 = vsel %vm190_vm0, %v156_v0, 0  ;;  %v2130_v4 = vld [vmem:[#allocation2] sm:$0xff]   ;;  %v2132_v6 = vld [vmem:[#allocation2 + $0x8] sm:$0xff]   ;;  %v2419_v18 = vmov 0.0  }
  0xa3   :  { %2107 = vmatprep.subr.msk.bf16.mxu1 %vm190_vm0, %v267_v1  ;;  %v301_v3 = vsel %vm190_vm0, %v267_v1, 0  ;;  %v2131_v5 = vld [vmem:[#allocation5] sm:$0xff]   ;;  %1933 = vmatpush3.bf16.msra.mxu0 %v192_v2  ;;  %v2133_v7 = vld [vmem:[#allocation5 + $0x8] sm:$0xff]   ;;  %v376_v8 = vld [vmem:[#allocation13] sm:$0xf]  ;;  %vm2420_vm2 = vmmov 0  }
  0xa4   :  { %1943 = vmatpush3.bf16.msra.mxu1 %v301_v3  ;;  %1934 = vmatprep.mubr.msk.bf16.mxu0 %vm177_vm1, %v2130_v4  ;;  %v410_v9 = vsel %vm190_vm0, %v376_v8, 0  ;;  %v2134_v10 = vld [vmem:[#allocation2 + $0x10] sm:$0xff]   ;;  %v2135_v12 = vld [vmem:[#allocation2 + $0x18] sm:$0xff]   ;;  %v2138_v14 = vld [vmem:[#allocation7] sm:$0xff]   ;;  %vm1757_vm11 = vcmask 261120   ;;  %s2421_s8 = smov [#allocation17]  }
  0xa5   :  { %1944 = vmatprep.mubr.msk.bf16.mxu1 %vm177_vm1, %v2131_v5  ;;  %2108 = vmatprep.subr.msk.bf16.mxu0 %vm190_vm0, %v376_v8  ;;  %v2136_v11 = vld [vmem:[#allocation5 + $0x10] sm:$0xff]   ;;  %v2137_v13 = vld [vmem:[#allocation5 + $0x18] sm:$0xff]   ;;  %v2139_v15 = vld [vmem:[#allocation7 + $0x8] sm:$0xff]   ;;  %s1788_s12 = sshll.u32 %s2421_s8, 4  ;;  %s1789_s12 = int_to_ptr.vmem [resolvable:$true] %s1788_s12 }
  0xa6   :  { %1935 = vmatmul.mubr.msk.bf16.vlgmr.msra.gmra.mrb[0].mxu0 %vm177_vm1, %v2132_v6  ;;  %v2140_v16 = vld [vmem:[#allocation7 + $0x10] sm:$0xff]   ;;  %v2141_v17 = vld [vmem:[#allocation7 + $0x18] sm:$0xff]   ;;  %1962 = vmatprep.subr.bf16.mxu1 %v2419_v18  ;;  %v2703_v8 = vld [vmem:[#allocation8] ss:$12 sps:$4 sm:$0xff]   ;;  %s2372_s29 = scalar_lea.vmem %s1789_s12, 256  ;;  %p2377_p3 = scmp.lt.s32.totalorder %s1789_s12, %s1789_s12 }
  0xa7   :  { %1945 = vmatmul.mubr.msk.bf16.vlgmr.msra.gmra.mrb[0].mxu1 %vm177_vm1, %v2133_v7  ;;  %1953 = vmatpush3.bf16.msra.mxu0 %v410_v9  ;;  %v2109_v7 = vld [vmem:[#allocation8 + $0x4] sm:$0xff]   ;;  %p2373_p2 = scmp.ne.s32.totalorder %s1789_s12, %s2372_s29  ;;  %p2378_p4 = scmp.lt.s32.totalorder %s2372_s29, %s2372_s29 }
  0xa8   :  { %1938 = vmatprep.mubr.msk.bf16.mxu0 %vm177_vm1, %v2134_v10  ;;  %1948 = vmatprep.mubr.msk.bf16.mxu1 %vm177_vm1, %v2136_v11  ;;  %v1859_v9 = vunpack.c.0.s8 %v2109_v7  ;;  %v1855_v10 = vunpack.c.0.s8 %v2703_v8 }
  0xa9   :  { %1974 = vmatprep.subr.bf16.mxu0 %v2419_v18  ;;  %p2379_p5 = por %p2378_p4, %p2377_p3 }
  0xaa   :  { %v887_v11 = vcvt.s32.f32 %v1859_v9 }
  0xab   :  { %p2380_p6 = pnand %p2379_p5, %p2373_p2 }
  0xac   :  { %vm895_vm3 = vcmp.eq.f32.partialorder %v887_v11, 1.0 }
  0xae   :  { %1939 = vmatmul.mubr.msk.bf16.gmra.mrb[4].mxu0 %vm177_vm1, %v2135_v12  ;;  %v885_v12 = vcvt.s32.f32 %v1855_v10 }
  0xaf   :  { %1949 = vmatmul.mubr.msk.bf16.gmra.mrb[4].mxu1 %vm177_vm1, %v2137_v13  ;;  %1954 = vmatprep.mubr.msk.bf16.mxu0 %vm177_vm1, %v2138_v14  ;;  %v1856_v13 = vunpack.c.1.s8 %v2703_v8  ;;  %v1863_v14 = vunpack.c.2.s8 %v2109_v7 }
  0xb0   :  { %1964 = vmatprep.mubr.msk.bf16.mxu1 %vm2420_vm2, %v2419_v18  ;;  %vm893_vm4 = vcmp.eq.f32.partialorder %v885_v12, 1.0 }
  0xb6   :  { %1955 = vmatmul.mubr.msk.bf16.vlgmr.msra.gmra.mrb[8].mxu0 %vm177_vm1, %v2139_v15 }
  0xb7   :  { %1958 = vmatprep.mubr.msk.bf16.mxu0 %vm177_vm1, %v2140_v16 }
  0xbe   :  { %1959 = vmatmul.mubr.msk.bf16.gmra.mrb[12].mxu0 %vm177_vm1, %v2141_v17 }
  0xbf   :  { %1976 = vmatprep.mubr.msk.bf16.mxu0 %vm2420_vm2, %v2419_v18 }
 0x179   :  { %v2639_v19 = vpop.f32.mrb[0].mxu0 }
 0x17a   :  { %v1946_v20 = vpop.f32.mrb[0].mxu1  ;;  %v2641_v21 = vpop.f32.mrb[1].mxu0 }
 0x17b   :  { %v487_v22 = vpack.c.bf16 %v1946_v20, %v1946_v20  ;;  %v337_v23 = vpop.f32.mrb[1].mxu1  ;;  %v2643_v24 = vpop.f32.mrb[2].mxu0  ;;  %v493_v59 = vpack.c.bf16 %v2641_v21, %v2641_v21 }
 0x17c   :  { %v485_v25 = vpack.c.bf16 %v337_v23, %v337_v23  ;;  %v1947_v26 = vpop.f32.mrb[2].mxu1  ;;  %v2645_v27 = vpop.f32.mrb[3].mxu0 }
 0x17d   :  { %v597_v28 = vsel %vm177_vm1, %v487_v22, 0  ;;  %v340_v29 = vpop.f32.mrb[3].mxu1  ;;  %v488_v50 = vpack.c.bf16 %v1947_v26, %v1947_v26  ;;  %v1009_v63 = vsel %vm190_vm0, %v493_v59, 0  ;;  %v494_v4 = vpack.c.bf16 %v2645_v27, %v2645_v27 }
 0x17e   :  { %v505_v30 = vsel %vm177_vm1, %v485_v25, 0  ;;  %1975 = vmatpush3.bf16.xpose.msra.mxu0 %v597_v28  ;;  %v486_v40 = vpack.c.bf16 %v340_v29, %v340_v29  ;;  %v886_v29 = vcvt.s32.f32 %v1856_v13 }
 0x17f   :  { %1963 = vmatpush3.bf16.xpose.msra.mxu1 %v505_v30  ;;  %1986 = vmatprep.subr.bf16.mxu0 %v2419_v18  ;;  %v643_v58 = vsel %vm177_vm1, %v488_v50, 0  ;;  %v1055_v6 = vsel %vm190_vm0, %v494_v4, 0  ;;  %v889_v30 = vcvt.s32.f32 %v1863_v14 }
 0x180   :  { %1968 = vmatprep.subr.bf16.mxu1 %v2419_v18  ;;  %v551_v48 = vsel %vm177_vm1, %v486_v40, 0  ;;  %vm894_vm5 = vcmp.eq.f32.partialorder %v886_v29, 1.0 }
 0x181   :  { %v2651_v31 = vpop.f32.mrb[4].mxu0  ;;  %vm897_vm6 = vcmp.eq.f32.partialorder %v889_v30, 1.0 }
 0x182   :  { %v2653_v32 = vpop.f32.mrb[5].mxu0  ;;  %v1950_v33 = vpop.f32.mrb[4].mxu1 }
 0x183   :  { %v2655_v34 = vpop.f32.mrb[6].mxu0  ;;  %v353_v35 = vpop.f32.mrb[5].mxu1  ;;  %v491_v49 = vpack.c.bf16 %v1950_v33, %v1950_v33 }
 0x184   :  { %v2657_v36 = vpop.f32.mrb[7].mxu0  ;;  %v1951_v37 = vpop.f32.mrb[6].mxu1  ;;  %v489_v39 = vpack.c.bf16 %v353_v35, %v353_v35  ;;  %v1860_v35 = vunpack.c.1.s8 %v2109_v7 }
 0x185   :  { %v356_v38 = vpop.f32.mrb[7].mxu1  ;;  %v781_v53 = vsel %vm177_vm1, %v491_v49, 0  ;;  %v492_v1 = vpack.c.bf16 %v1951_v37, %v1951_v37  ;;  %v1867_v37 = vunpack.c.2.s8 %v2703_v8 }
 0x186   :  { %v689_v42 = vsel %vm177_vm1, %v489_v39, 0  ;;  %v490_v61 = vpack.c.bf16 %v356_v38, %v356_v38 }
 0x187   :  { %v827_v3 = vsel %vm177_vm1, %v492_v1, 0 }
 0x188   :  { %v735_v0 = vsel %vm177_vm1, %v490_v61, 0 }
 0x189   :  { %v1956_v41 = vpop.f32.mrb[8].mxu0 }
 0x18a   :  { %v479_v43 = vpack.c.bf16 %v1956_v41, %v1956_v41  ;;  %v446_v44 = vpop.f32.mrb[9].mxu0 }
 0x18b   :  { %v477_v45 = vpack.c.bf16 %v446_v44, %v446_v44  ;;  %v1957_v46 = vpop.f32.mrb[10].mxu0 }
 0x18c   :  { %v449_v47 = vpop.f32.mrb[11].mxu0  ;;  %1977 = vmatmul.mubr.msk.bf16.vlgmr.msra.gmra.mrb[16].mxu0 %vm177_vm1, %v479_v43  ;;  %v480_v62 = vpack.c.bf16 %v1957_v46, %v1957_v46 }
 0x18d   :  { %1965 = vmatmul.mubr.msk.bf16.vlgmr.msra.gmra.mrb[8].mxu1 %vm177_vm1, %v477_v45  ;;  %1987 = vmatpush3.bf16.xpose.msra.mxu0 %v689_v42  ;;  %v478_v54 = vpack.c.bf16 %v449_v47, %v449_v47  ;;  %v888_v47 = vcvt.s32.f32 %v1860_v35 }
 0x18e   :  { %1969 = vmatpush3.bf16.xpose.msra.mxu1 %v551_v48  ;;  %1970 = vmatprep.mubr.msk.bf16.mxu1 %vm2420_vm2, %v2419_v18  ;;  %v891_v48 = vcvt.s32.f32 %v1867_v37 }
 0x18f   :  { %1980 = vmatprep.subr.bf16.mxu1 %v2419_v18  ;;  %1988 = vmatprep.mubr.msk.bf16.mxu0 %vm2420_vm2, %v2419_v18  ;;  %vm896_vm7 = vcmp.eq.f32.partialorder %v888_v47, 1.0 }
 0x190   :  { %1998 = vmatprep.subr.bf16.mxu0 %v2419_v18  ;;  %vm899_vm8 = vcmp.eq.f32.partialorder %v891_v48, 1.0 }
 0x191   :  { %v1960_v51 = vpop.f32.mrb[12].mxu0 }
 0x192   :  { %v462_v52 = vpop.f32.mrb[13].mxu0  ;;  %v483_v60 = vpack.c.bf16 %v1960_v51, %v1960_v51 }
 0x193   :  { %v481_v55 = vpack.c.bf16 %v462_v52, %v462_v52  ;;  %v1961_v56 = vpop.f32.mrb[14].mxu0  ;;  %v1864_v52 = vunpack.c.3.s8 %v2109_v7 }
 0x194   :  { %v465_v57 = vpop.f32.mrb[15].mxu0  ;;  %v484_v5 = vpack.c.bf16 %v1961_v56, %v1961_v56 }
 0x195   :  { %1971 = vmatmul.mubr.msk.bf16.vlgmr.msra.gmra.mrb[12].mxu1 %vm177_vm1, %v478_v54  ;;  %1989 = vmatmul.mubr.msk.bf16.vlgmr.msra.gmra.mrb[20].mxu0 %vm177_vm1, %v481_v55  ;;  %v482_v2 = vpack.c.bf16 %v465_v57, %v465_v57 }
 0x196   :  { %1981 = vmatpush3.bf16.xpose.msra.mxu1 %v643_v58  ;;  %1999 = vmatpush3.bf16.xpose.msra.mxu0 %v781_v53 }
 0x197   :  { %1982 = vmatprep.mubr.msk.bf16.mxu1 %vm2420_vm2, %v2419_v18  ;;  %1992 = vmatprep.subr.bf16.mxu1 %v2419_v18 }
 0x198   :  { %2000 = vmatprep.mubr.msk.bf16.mxu0 %vm2420_vm2, %v2419_v18  ;;  %2010 = vmatprep.subr.bf16.mxu0 %v2419_v18 }
 0x19d   :  { %1983 = vmatmul.mubr.msk.bf16.vlgmr.msra.gmra.mrb[16].mxu1 %vm177_vm1, %v480_v62  ;;  %2001 = vmatmul.mubr.msk.bf16.vlgmr.msra.gmra.mrb[24].mxu0 %vm177_vm1, %v483_v60 }
 0x19e   :  { %1993 = vmatpush3.bf16.xpose.msra.mxu1 %v735_v0  ;;  %2011 = vmatpush3.bf16.msra.mxu0 %v1009_v63  ;;  %v890_v63 = vcvt.s32.f32 %v1864_v52 }
 0x19f   :  { %1994 = vmatprep.mubr.msk.bf16.mxu1 %vm2420_vm2, %v2419_v18  ;;  %2004 = vmatprep.subr.bf16.mxu1 %v2419_v18 }
 0x1a0   :  { %2012 = vmatprep.mubr.msk.bf16.mxu0 %vm2420_vm2, %v2419_v18  ;;  %2022 = vmatprep.subr.bf16.mxu0 %v2419_v18  ;;  %vm898_vm9 = vcmp.eq.f32.partialorder %v890_v63, 1.0 }
 0x1a5   :  { %1995 = vmatmul.mubr.msk.bf16.vlgmr.msra.gmra.mrb[20].mxu1 %vm177_vm1, %v482_v2  ;;  %v1868_v2 = vunpack.c.3.s8 %v2703_v8 }
 0x1a6   :  { %2005 = vmatpush3.bf16.xpose.msra.mxu1 %v827_v3  ;;  %2006 = vmatprep.mubr.msk.bf16.mxu1 %vm2420_vm2, %v2419_v18 }
 0x1a7   :  { %2016 = vmatprep.subr.bf16.mxu1 %v2419_v18  ;;  %v892_v9 = vcvt.s32.f32 %v1868_v2 }
 0x1a9   :  { %vm900_vm10 = vcmp.eq.f32.partialorder %v892_v9, 1.0 }
 0x1ad   :  { %2007 = vmatmul.mubr.msk.bf16.vlgmr.msra.gmra.mrb[24].mxu1 %vm177_vm1, %v484_v5 }
 0x1ae   :  { %2017 = vmatpush3.bf16.msra.mxu1 %v1055_v6  ;;  %2018 = vmatprep.mubr.msk.bf16.mxu1 %vm2420_vm2, %v2419_v18 }
 0x1af   :  { %2028 = vmatprep.subr.bf16.mxu1 %v2419_v18 }
 0x25f   :  { %v633_v15 = vpop.f32.mrb[16].mxu0 }
 0x260   :  { %v2707_v16 = vsel %vm895_vm3, -1e+20, %v633_v15  ;;  %v541_v17 = vpop.f32.mrb[8].mxu1  ;;  %v1978_v20 = vpop.f32.mrb[17].mxu0 }
 0x261   :  { %v2709_v21 = vsel %vm893_vm4, -1e+20, %v541_v17  ;;  %v1966_v22 = vpop.f32.mrb[9].mxu1  ;;  %v636_v23 = vpop.f32.mrb[18].mxu0  ;;  %v915_v25 = vsel %vm177_vm1, %v2707_v16, -inf }
 0x262   :  { %v544_v26 = vpop.f32.mrb[10].mxu1  ;;  %916 = vmax.xlane.f32.xlu1 %v915_v25  ;;  %v1979_v27 = vpop.f32.mrb[19].mxu0  ;;  %v909_v28 = vsel %vm177_vm1, %v2709_v21, -inf }
 0x263   :  { %910 = vmax.xlane.f32.xlu0 %v909_v28  ;;  %v1967_v33 = vpop.f32.mrb[11].mxu1 }
 0x268   :  { %v587_v38 = vpop.f32.mrb[12].mxu1  ;;  %v725_v39 = vpop.f32.mrb[20].mxu0 }
 0x269   :  { %v902_v40 = vsel %vm894_vm5, -1e+20, %v587_v38  ;;  %v1972_v41 = vpop.f32.mrb[13].mxu1  ;;  %v2716_v42 = vsel %vm897_vm6, -1e+20, %v725_v39  ;;  %v1990_v43 = vpop.f32.mrb[21].mxu0 }
 0x26a   :  { %v590_v44 = vpop.f32.mrb[14].mxu1  ;;  %v912_v45 = vsel %vm177_vm1, %v902_v40, -inf  ;;  %v728_v46 = vpop.f32.mrb[22].mxu0  ;;  %v921_v51 = vsel %vm177_vm1, %v2716_v42, -inf }
 0x26b   :  { %913 = vmax.xlane.f32.xlu0 %v912_v45  ;;  %v1973_v49 = vpop.f32.mrb[15].mxu1  ;;  %v1991_v50 = vpop.f32.mrb[23].mxu0 }
 0x26f   :  { %922 = vmax.xlane.f32.xlu0 %v921_v51 }
 0x270   :  { %v679_v53 = vpop.f32.mrb[16].mxu1  ;;  %v817_v54 = vpop.f32.mrb[24].mxu0 }
 0x271   :  { %v904_v55 = vsel %vm896_vm7, -1e+20, %v679_v53  ;;  %v907_v56 = vsel %vm899_vm8, -1e+20, %v817_v54  ;;  %v1984_v57 = vpop.f32.mrb[17].mxu1  ;;  %v2002_v58 = vpop.f32.mrb[25].mxu0 }
 0x272   :  { %v682_v59 = vpop.f32.mrb[18].mxu1  ;;  %v918_v60 = vsel %vm177_vm1, %v904_v55, -inf  ;;  %v927_v61 = vsel %vm177_vm1, %v907_v56, -inf  ;;  %v820_v62 = vpop.f32.mrb[26].mxu0 }
 0x273   :  { %v1985_v0 = vpop.f32.mrb[19].mxu1  ;;  %919 = vmax.xlane.f32.xlu1 %v918_v60  ;;  %928 = vmax.xlane.f32.xlu0 %v927_v61  ;;  %v2003_v1 = vpop.f32.mrb[27].mxu0 }
 0x278   :  { %v771_v3 = vpop.f32.mrb[20].mxu1 }
 0x279   :  { %v906_v4 = vsel %vm898_vm9, -1e+20, %v771_v3  ;;  %v1996_v5 = vpop.f32.mrb[21].mxu1  ;;  %v495_v3 = vpack.c.bf16 %v2639_v19, %v2639_v19 }
 0x27a   :  { %v774_v6 = vpop.f32.mrb[22].mxu1  ;;  %v924_v7 = vsel %vm177_vm1, %v906_v4, -inf }
 0x27b   :  { %925 = vmax.xlane.f32.xlu1 %v924_v7  ;;  %v1997_v10 = vpop.f32.mrb[23].mxu1  ;;  %v1101_v9 = vsel %vm190_vm0, %v495_v3, 0 }
 0x280   :  { %v863_v11 = vpop.f32.mrb[24].mxu1 }
 0x281   :  { %v908_v12 = vsel %vm900_vm10, -1e+20, %v863_v11  ;;  %v2008_v13 = vpop.f32.mrb[25].mxu1 }
 0x282   :  { %v866_v14 = vpop.f32.mrb[26].mxu1  ;;  %v930_v15 = vsel %vm177_vm1, %v908_v12, -inf  ;;  %v496_v13 = vpack.c.bf16 %v2643_v24, %v2643_v24 }
 0x283   :  { %931 = vmax.xlane.f32.xlu1 %v930_v15  ;;  %v2009_v17 = vpop.f32.mrb[27].mxu1  ;;  %v497_v14 = vpack.c.bf16 %v2653_v32, %v2653_v32 }
 0x2ef   :  { %v917_v20 = vpop.xlane.xlu1 %916 }
 0x2f0   :  { %v935_v8 = vsub.f32 %v2707_v16, %v917_v20  ;;  %v911_v22 = vpop.xlane.xlu0 %910 }
 0x2f1   :  { %v933_v23 = vsub.f32 %v2709_v21, %v911_v22  ;;  %v1147_v22 = vsel %vm190_vm0, %v496_v13, 0 }
 0x2f2   :  { %v945_v25 = vmul.f32 1.442695, %v935_v8 }
 0x2f3   :  { %v941_v26 = vmul.f32 1.442695, %v933_v23  ;;  %v1193_v23 = vsel %vm190_vm0, %v497_v14, 0 }
 0x2f5   :  { %2142 = vpow2.f32 %v941_v26  ;;  %v499_v26 = vpack.c.bf16 %v2651_v31, %v2651_v31 }
 0x2f6   :  { %2144 = vpow2.f32 %v945_v25 }
 0x2f8   :  { %v914_v27 = vpop.xlane.xlu0 %913 }
 0x2f9   :  { %v934_v28 = vsub.f32 %v902_v40, %v914_v27  ;;  %v498_v27 = vpack.c.bf16 %v2657_v36, %v2657_v36 }
 0x2fb   :  { %v943_v29 = vmul.f32 1.442695, %v934_v28 }
 0x2fc   :  { %v923_v30 = vpop.xlane.xlu0 %922 }
 0x2fd   :  { %2146 = vpow2.f32 %v943_v29  ;;  %v937_v33 = vsub.f32 %v2716_v42, %v923_v30 }
 0x2ff   :  { %v2143_v35 = vpop.eup %2142  ;;  %v949_v37 = vmul.f32 1.442695, %v937_v33 }
 0x300   :  { %v920_v38 = vpop.xlane.xlu1 %919  ;;  %v929_v39 = vpop.xlane.xlu0 %928  ;;  %v957_v16 = vsel %vm177_vm1, %v2143_v35, 0.0 }
 0x301   :  { %v2145_v41 = vpop.eup %2144  ;;  %2148 = vpow2.f32 %v949_v37  ;;  %v936_v21 = vsub.f32 %v904_v55, %v920_v38  ;;  %v939_v43 = vsub.f32 %v907_v56, %v929_v39  ;;  %958 = vadd.xlane.f32.xlu0 %v957_v16  ;;  %v1239_v37 = vsel %vm190_vm0, %v498_v27, 0 }
 0x302   :  { %v963_v40 = vsel %vm177_vm1, %v2145_v41, 0.0  ;;  %v500_v39 = vpack.c.bf16 %v2655_v34, %v2655_v34 }
 0x303   :  { %v947_v44 = vmul.f32 1.442695, %v936_v21  ;;  %v953_v45 = vmul.f32 1.442695, %v939_v43 }
 0x304   :  { %v1331_v43 = vsel %vm190_vm0, %v500_v39, 0 }
 0x305   :  { %2150 = vpow2.f32 %v947_v44  ;;  %964 = vadd.xlane.f32.xlu0 %v963_v40  ;;  %v1381_v40 = vld [vmem:[#allocation14] sm:$0xf] }
 0x306   :  { %2152 = vpow2.f32 %v953_v45 }
 0x307   :  { %v2147_v46 = vpop.eup %2146 }
 0x308   :  { %v926_v42 = vpop.xlane.xlu1 %925  ;;  %v960_v47 = vsel %vm177_vm1, %v2147_v46, 0.0 }
 0x309   :  { %v938_v48 = vsub.f32 %v906_v4, %v926_v42  ;;  %961 = vadd.xlane.f32.xlu1 %v960_v47  ;;  %v1382_v42 = vld [vmem:[#allocation14 + $0x4] sm:$0xf] }
 0x30a   :  { %v1439_v47 = vsel %vm190_vm0, %v1382_v42, 0 }
 0x30b   :  { %v2149_v49 = vpop.eup %2148  ;;  %v951_v50 = vmul.f32 1.442695, %v938_v48  ;;  %v1383_v48 = vld [vmem:[#allocation14 + $0x8] sm:$0xf] }
 0x30c   :  { %v969_v51 = vsel %vm177_vm1, %v2149_v49, 0.0 }
 0x30d   :  { %2154 = vpow2.f32 %v951_v50  ;;  %970 = vadd.xlane.f32.xlu0 %v969_v51 }
 0x30f   :  { %v2151_v52 = vpop.eup %2150 }
 0x310   :  { %v2733_v53 = vpop.eup %2152  ;;  %v932_v54 = vpop.xlane.xlu1 %931  ;;  %v966_v55 = vsel %vm177_vm1, %v2151_v52, 0.0 }
 0x311   :  { %v940_v56 = vsub.f32 %v908_v12, %v932_v54  ;;  %v975_v57 = vsel %vm177_vm1, %v2733_v53, 0.0  ;;  %967 = vadd.xlane.f32.xlu1 %v966_v55  ;;  %v1384_v55 = vld [vmem:[#allocation14 + $0xc] sm:$0xf] }
 0x312   :  { %976 = vadd.xlane.f32.xlu0 %v975_v57 }
 0x313   :  { %v955_v58 = vmul.f32 1.442695, %v940_v56  ;;  %v1385_v56 = vld [vmem:[#allocation14 + $0x10] sm:$0xf] }
 0x315   :  { %2156 = vpow2.f32 %v955_v58 }
 0x317   :  { %v2738_v59 = vpop.eup %2154 }
 0x318   :  { %v972_v60 = vsel %vm177_vm1, %v2738_v59, 0.0 }
 0x319   :  { %973 = vadd.xlane.f32.xlu1 %v972_v60 }
 0x31f   :  { %v2742_v61 = vpop.eup %2156 }
 0x320   :  { %v978_v62 = vsel %vm177_vm1, %v2742_v61, 0.0 }
 0x321   :  { %979 = vadd.xlane.f32.xlu1 %v978_v62 }
 0x38e   :  { %v959_v63 = vpop.xlane.xlu0 %958 }
 0x38f   :  { %2158 = vrcp.f32 %v959_v63  ;;  %v1531_v63 = vsel %vm190_vm0, %v1384_v55, 0 }
 0x392   :  { %v965_v0 = vpop.xlane.xlu0 %964 }
 0x393   :  { %2160 = vrcp.f32 %v965_v0  ;;  %v1577_v0 = vsel %vm190_vm0, %v1385_v56, 0  ;;  %v1852_v56 = vld [vmem:[#allocation16] ss:$0 sm:$0xff] }
 0x396   :  { %v962_v1 = vpop.xlane.xlu1 %961 }
 0x397   :  { %2162 = vrcp.f32 %v962_v1 }
 0x399   :  { %v2159_v2 = vpop.eup %2158 }
 0x39a   :  { %v989_v4 = vmul.f32 %v2159_v2, %v2143_v35  ;;  %v971_v5 = vpop.xlane.xlu0 %970  ;;  %v1285_v35 = vsel %vm190_vm0, %v499_v26, 0 }
 0x39b   :  { %2164 = vrcp.f32 %v971_v5  ;;  %v1386_v5 = vld [vmem:[#allocation14 + $0x14] sm:$0xf] }
 0x39c   :  { %v997_v6 = vpack.c.bf16 %v989_v4, %v989_v4  ;;  %v1623_v13 = vsel %vm190_vm0, %v1386_v5, 0 }
 0x39d   :  { %v2161_v7 = vpop.eup %2160 }
 0x39e   :  { %2013 = vmatmul.mubr.msk.bf16.vlgmr.msra.gmra.mrb[28].mxu0 %vm177_vm1, %v997_v6  ;;  %v968_v10 = vpop.xlane.xlu1 %967  ;;  %v991_v11 = vmul.f32 %v2161_v7, %v2145_v41  ;;  %v1387_v6 = vld [vmem:[#allocation14 + $0x18] sm:$0xf] }
 0x39f   :  { %2023 = vmatpush3.bf16.msra.mxu0 %v1101_v9  ;;  %2166 = vrcp.f32 %v968_v10  ;;  %2024 = vmatprep.mubr.msk.bf16.mxu0 %vm2420_vm2, %v2419_v18  ;;  %v977_v12 = vpop.xlane.xlu0 %976  ;;  %v1669_v14 = vsel %vm190_vm0, %v1387_v6, 0 }
 0x3a0   :  { %2034 = vmatprep.subr.bf16.mxu0 %v2419_v18  ;;  %2168 = vrcp.f32 %v977_v12  ;;  %v999_v20 = vpack.c.bf16 %v991_v11, %v991_v11 }
 0x3a1   :  { %v2163_v19 = vpop.eup %2162 }
 0x3a2   :  { %v990_v15 = vmul.f32 %v2163_v19, %v2147_v46  ;;  %v1393_v46 = vsel %vm190_vm0, %v1381_v40, 0 }
 0x3a4   :  { %v998_v17 = vpack.c.bf16 %v990_v15, %v990_v15 }
 0x3a5   :  { %v2165_v8 = vpop.eup %2164 }
 0x3a6   :  { %2019 = vmatmul.mubr.msk.bf16.vlgmr.msra.gmra.mrb[28].mxu1 %vm177_vm1, %v998_v17  ;;  %2025 = vmatmul.mubr.msk.bf16.vlgmr.msra.gmra.mrb[32].mxu0 %vm177_vm1, %v999_v20  ;;  %v974_v25 = vpop.xlane.xlu1 %973  ;;  %v993_v24 = vmul.f32 %v2165_v8, %v2149_v49 }
 0x3a7   :  { %2029 = vmatpush3.bf16.msra.mxu1 %v1147_v22  ;;  %2035 = vmatpush3.bf16.msra.mxu0 %v1193_v23  ;;  %2170 = vrcp.f32 %v974_v25  ;;  %v1388_v22 = vld [vmem:[#allocation14 + $0x1c] sm:$0xf] }
 0x3a8   :  { %2030 = vmatprep.mubr.msk.bf16.mxu1 %vm2420_vm2, %v2419_v18  ;;  %2036 = vmatprep.mubr.msk.bf16.mxu0 %vm2420_vm2, %v2419_v18  ;;  %v1001_v30 = vpack.c.bf16 %v993_v24, %v993_v24 }
 0x3a9   :  { %v2167_v32 = vpop.eup %2166  ;;  %2040 = vmatprep.subr.bf16.mxu1 %v2419_v18  ;;  %2046 = vmatprep.subr.bf16.mxu0 %v2419_v18 }
 0x3aa   :  { %v992_v28 = vmul.f32 %v2167_v32, %v2151_v52  ;;  %v2169_v33 = vpop.eup %2168  ;;  %v1485_v52 = vsel %vm190_vm0, %v1383_v48, 0 }
 0x3ab   :  { %v995_v31 = vmul.f32 %v2169_v33, %v2733_v53 }
 0x3ac   :  { %v1000_v29 = vpack.c.bf16 %v992_v28, %v992_v28  ;;  %v1715_v28 = vsel %vm190_vm0, %v1388_v22, 0 }
 0x3ad   :  { %v1003_v41 = vpack.c.bf16 %v995_v31, %v995_v31 }
 0x3ae   :  { %2031 = vmatmul.mubr.msk.bf16.vlgmr.msra.gmra.mrb[32].mxu1 %vm177_vm1, %v1000_v29  ;;  %2037 = vmatmul.mubr.msk.bf16.vlgmr.msra.gmra.mrb[36].mxu0 %vm177_vm1, %v1001_v30  ;;  %v980_v38 = vpop.xlane.xlu1 %979 }
 0x3af   :  { %2041 = vmatpush3.bf16.msra.mxu1 %v1239_v37  ;;  %2047 = vmatpush3.bf16.msra.mxu0 %v1285_v35  ;;  %2172 = vrcp.f32 %v980_v38 }
 0x3b0   :  { %2042 = vmatprep.mubr.msk.bf16.mxu1 %vm2420_vm2, %v2419_v18  ;;  %2048 = vmatprep.mubr.msk.bf16.mxu0 %vm2420_vm2, %v2419_v18 }
 0x3b1   :  { %v2171_v36 = vpop.eup %2170  ;;  %2052 = vmatprep.subr.bf16.mxu1 %v2419_v18  ;;  %2058 = vmatprep.subr.bf16.mxu0 %v2419_v18 }
 0x3b2   :  { %v994_v16 = vmul.f32 %v2171_v36, %v2738_v59 }
 0x3b4   :  { %v1002_v21 = vpack.c.bf16 %v994_v16, %v994_v16 }
 0x3b6   :  { %2043 = vmatmul.mubr.msk.bf16.vlgmr.msra.gmra.mrb[36].mxu1 %vm177_vm1, %v1002_v21  ;;  %2049 = vmatmul.mubr.msk.bf16.vlgmr.msra.gmra.mrb[40].mxu0 %vm177_vm1, %v1003_v41 }
 0x3b7   :  { %2053 = vmatpush3.bf16.msra.mxu1 %v1331_v43  ;;  %2054 = vmatprep.mubr.msk.bf16.mxu1 %vm2420_vm2, %v2419_v18 }
 0x3b8   :  { %2060 = vmatprep.mubr.msk.bf16.mxu0 %vm2420_vm2, %v2419_v18  ;;  %2064 = vmatprep.subr.bf16.mxu1 %v2419_v18 }
 0x3b9   :  { %v2173_v34 = vpop.eup %2172  ;;  %2059 = vmatpush3.bf16.msra.mxu0 %v1393_v46 }
 0x3ba   :  { %v996_v44 = vmul.f32 %v2173_v34, %v2742_v61  ;;  %2070 = vmatprep.subr.bf16.mxu0 %v2419_v18 }
 0x3bc   :  { %v1004_v45 = vpack.c.bf16 %v996_v44, %v996_v44 }
 0x3be   :  { %2055 = vmatmul.mubr.msk.bf16.vlgmr.msra.gmra.mrb[40].mxu1 %vm177_vm1, %v1004_v45 }
 0x3bf   :  { %2066 = vmatprep.mubr.msk.bf16.mxu1 %vm2420_vm2, %v2419_v18  ;;  %2065 = vmatpush3.bf16.msra.mxu1 %v1439_v47 }
 0x3c0   :  { %2076 = vmatprep.subr.bf16.mxu1 %v2419_v18 }
 0x471   :  { %v1045_v49 = vpop.f32.mrb[28].mxu0 }
 0x472   :  { %v1373_v50 = vpack.c.bf16 %v1045_v49, %v1045_v49  ;;  %v2014_v51 = vpop.f32.mrb[29].mxu0 }
 0x473   :  { %v1048_v53 = vpop.f32.mrb[30].mxu0 }
 0x474   :  { %v2015_v54 = vpop.f32.mrb[31].mxu0  ;;  %2061 = vmatmul.mubr.msk.bf16.vlgmr.msra.gmra.mrb[44].mxu0 %vm177_vm1, %v1373_v50 }
 0x475   :  { %2071 = vmatpush3.bf16.msra.mxu0 %v1485_v52  ;;  %2072 = vmatprep.mubr.msk.bf16.mxu0 %vm2420_vm2, %v2419_v18 }
 0x476   :  { %2082 = vmatprep.subr.bf16.mxu0 %v2419_v18 }
 0x479   :  { %v1091_v57 = vpop.f32.mrb[28].mxu1  ;;  %v1137_v58 = vpop.f32.mrb[32].mxu0 }
 0x47a   :  { %v1374_v59 = vpack.c.bf16 %v1091_v57, %v1091_v57  ;;  %v1375_v60 = vpack.c.bf16 %v1137_v58, %v1137_v58  ;;  %v2020_v61 = vpop.f32.mrb[29].mxu1  ;;  %v2026_v62 = vpop.f32.mrb[33].mxu0 }
 0x47b   :  { %v1094_v1 = vpop.f32.mrb[30].mxu1  ;;  %v1140_v2 = vpop.f32.mrb[34].mxu0 }
 0x47c   :  { %v2021_v3 = vpop.f32.mrb[31].mxu1  ;;  %v2027_v4 = vpop.f32.mrb[35].mxu0  ;;  %2067 = vmatmul.mubr.msk.bf16.vlgmr.msra.gmra.mrb[44].mxu1 %vm177_vm1, %v1374_v59  ;;  %2073 = vmatmul.mubr.msk.bf16.vlgmr.msra.gmra.mrb[48].mxu0 %vm177_vm1, %v1375_v60 }
 0x47d   :  { %2077 = vmatpush3.bf16.msra.mxu1 %v1531_v63  ;;  %2083 = vmatpush3.bf16.msra.mxu0 %v1577_v0 }
 0x47e   :  { %2078 = vmatprep.mubr.msk.bf16.mxu1 %vm2420_vm2, %v2419_v18  ;;  %2084 = vmatprep.mubr.msk.bf16.mxu0 %vm2420_vm2, %v2419_v18 }
 0x47f   :  { %2088 = vmatprep.subr.bf16.mxu1 %v2419_v18  ;;  %2094 = vmatprep.subr.bf16.mxu0 %v2419_v18 }
 0x481   :  { %v1183_v7 = vpop.f32.mrb[32].mxu1  ;;  %v1229_v9 = vpop.f32.mrb[36].mxu0 }
 0x482   :  { %v1376_v10 = vpack.c.bf16 %v1183_v7, %v1183_v7  ;;  %v1377_v11 = vpack.c.bf16 %v1229_v9, %v1229_v9  ;;  %v2032_v12 = vpop.f32.mrb[33].mxu1  ;;  %v2038_v19 = vpop.f32.mrb[37].mxu0 }
 0x483   :  { %v1186_v15 = vpop.f32.mrb[34].mxu1  ;;  %v1232_v17 = vpop.f32.mrb[38].mxu0 }
 0x484   :  { %v2033_v20 = vpop.f32.mrb[35].mxu1  ;;  %v2039_v8 = vpop.f32.mrb[39].mxu0  ;;  %2079 = vmatmul.mubr.msk.bf16.vlgmr.msra.gmra.mrb[48].mxu1 %vm177_vm1, %v1376_v10  ;;  %2085 = vmatmul.mubr.msk.bf16.vlgmr.msra.gmra.mrb[52].mxu0 %vm177_vm1, %v1377_v11 }
 0x485   :  { %2089 = vmatpush3.bf16.msra.mxu1 %v1623_v13  ;;  %2095 = vmatpush3.bf16.msra.mxu0 %v1669_v14 }
 0x486   :  { %2090 = vmatprep.mubr.msk.bf16.mxu1 %vm2420_vm2, %v2419_v18  ;;  %2096 = vmatprep.mubr.msk.bf16.mxu0 %vm2420_vm2, %v2419_v18 }
 0x487   :  { %2100 = vmatprep.subr.bf16.mxu1 %v2419_v18 }
 0x489   :  { %v1275_v23 = vpop.f32.mrb[36].mxu1  ;;  %v1321_v25 = vpop.f32.mrb[40].mxu0 }
 0x48a   :  { %v1378_v24 = vpack.c.bf16 %v1275_v23, %v1275_v23  ;;  %v1379_v32 = vpack.c.bf16 %v1321_v25, %v1321_v25  ;;  %v2044_v26 = vpop.f32.mrb[37].mxu1  ;;  %v2050_v27 = vpop.f32.mrb[41].mxu0 }
 0x48b   :  { %v1278_v29 = vpop.f32.mrb[38].mxu1  ;;  %v1324_v30 = vpop.f32.mrb[42].mxu0 }
 0x48c   :  { %v2045_v33 = vpop.f32.mrb[39].mxu1  ;;  %v2051_v35 = vpop.f32.mrb[43].mxu0  ;;  %2091 = vmatmul.mubr.msk.bf16.vlgmr.msra.gmra.mrb[52].mxu1 %vm177_vm1, %v1378_v24  ;;  %2097 = vmatmul.mubr.msk.bf16.vlgmr.msra.gmra.mrb[56].mxu0 %vm177_vm1, %v1379_v32 }
 0x48d   :  { %2101 = vmatpush3.bf16.msra.mxu1 %v1715_v28  ;;  %2102 = vmatprep.mubr.msk.bf16.mxu1 %vm2420_vm2, %v2419_v18 }
 0x491   :  { %v1367_v37 = vpop.f32.mrb[40].mxu1 }
 0x492   :  { %v1380_v38 = vpack.c.bf16 %v1367_v37, %v1367_v37  ;;  %v2056_v31 = vpop.f32.mrb[41].mxu1 }
 0x493   :  { %v1370_v36 = vpop.f32.mrb[42].mxu1 }
 0x494   :  { %v2057_v39 = vpop.f32.mrb[43].mxu1  ;;  %2103 = vmatmul.mubr.msk.bf16.vlgmr.msra.gmra.mrb[56].mxu1 %vm177_vm1, %v1380_v38 }
 0x547   :  { %v1429_v16 = vpop.f32.mrb[44].mxu0 }
 0x548   :  { %v2062_v41 = vpop.f32.mrb[45].mxu0  ;;  %v1758_v45 = vsel %vm1757_vm11, %v1429_v16, 0.0 }
 0x549   :  { %v1432_v21 = vpop.f32.mrb[46].mxu0 }
 0x54a   :  { %v2063_v43 = vpop.f32.mrb[47].mxu0 }
 0x54f   :  { %v1475_v34 = vpop.f32.mrb[44].mxu1  ;;  %v1521_v44 = vpop.f32.mrb[48].mxu0 }
 0x550   :  { %v1759_v40 = vsel %vm1757_vm11, %v1475_v34, 0.0  ;;  %v2068_v46 = vpop.f32.mrb[45].mxu1  ;;  %v2074_v18 = vpop.f32.mrb[49].mxu0  ;;  %v1761_v49 = vsel %vm1757_vm11, %v1521_v44, 0.0 }
 0x551   :  { %v1760_v42 = vadd.f32 %v1759_v40, %v1758_v45  ;;  %v1478_v47 = vpop.f32.mrb[46].mxu1  ;;  %v1524_v48 = vpop.f32.mrb[50].mxu0 }
 0x552   :  { %v2069_v50 = vpop.f32.mrb[47].mxu1  ;;  %v2075_v51 = vpop.f32.mrb[51].mxu0 }
 0x553   :  { %v1762_v52 = vadd.f32 %v1761_v49, %v1760_v42 }
 0x557   :  { %v1567_v53 = vpop.f32.mrb[48].mxu1  ;;  %v1613_v54 = vpop.f32.mrb[52].mxu0 }
 0x558   :  { %v1763_v55 = vsel %vm1757_vm11, %v1567_v53, 0.0  ;;  %v2080_v57 = vpop.f32.mrb[49].mxu1  ;;  %v2086_v58 = vpop.f32.mrb[53].mxu0  ;;  %v1765_v3 = vsel %vm1757_vm11, %v1613_v54, 0.0 }
 0x559   :  { %v1764_v59 = vadd.f32 %v1763_v55, %v1762_v52  ;;  %v1570_v60 = vpop.f32.mrb[50].mxu1  ;;  %v1616_v61 = vpop.f32.mrb[54].mxu0 }
 0x55a   :  { %v2081_v62 = vpop.f32.mrb[51].mxu1  ;;  %v2087_v63 = vpop.f32.mrb[55].mxu0 }
 0x55b   :  { %v1779_v0 = vadd.f32 %v1852_v56, %v1764_v59 }
 0x55d   :  { %1781 = vst.msk [vmem:[#allocation17] sm:$0xff] %vm1757_vm11, %v1779_v0 }
 0x55f   :  { %v1659_v1 = vpop.f32.mrb[52].mxu1  ;;  %v1705_v2 = vpop.f32.mrb[56].mxu0 }
 0x560   :  { %v1766_v4 = vsel %vm1757_vm11, %v1659_v1, 0.0  ;;  %v2092_v5 = vpop.f32.mrb[53].mxu1  ;;  %v2098_v6 = vpop.f32.mrb[57].mxu0  ;;  %v1768_v11 = vsel %vm1757_vm11, %v1705_v2, 0.0 }
 0x561   :  { %v1767_v7 = vadd.f32 %v1766_v4, %v1765_v3  ;;  %v1662_v9 = vpop.f32.mrb[54].mxu1  ;;  %v1708_v10 = vpop.f32.mrb[58].mxu0 }
 0x562   :  { %v2093_v12 = vpop.f32.mrb[55].mxu1  ;;  %v2099_v19 = vpop.f32.mrb[59].mxu0 }
 0x563   :  { %v1769_v13 = vadd.f32 %v1768_v11, %v1767_v7 }
 0x567   :  { %v1751_v14 = vpop.f32.mrb[56].mxu1 }
 0x568   :  { %v1770_v15 = vsel %vm1757_vm11, %v1751_v14, 0.0  ;;  %v2104_v17 = vpop.f32.mrb[57].mxu1 }
 0x569   :  { %v1771_v20 = vadd.f32 %v1770_v15, %v1769_v13  ;;  %v1754_v8 = vpop.f32.mrb[58].mxu1 }
 0x56a   :  { %v2105_v22 = vpop.f32.mrb[59].mxu1 }
 0x56b   :  { %v1780_v23 = vadd.f32 %v1852_v56, %v1771_v20 }
 0x56d   :  { %1782 = vst.msk [vmem:[#allocation17 + $0x8] sm:$0xff] %vm1757_vm11, %v1780_v23 }
 0x56e   :  { %2383 = shalt.err (!%p2380_p6)
}
 0x56f   :  { %s2384_s21 = scalar_lea.hbm %s2862_s9, 256 }
 0x570   :  { %p2385_p7 = scmp.ne.s32.totalorder %s2862_s9, %s2384_s21  ;;  %p2388_p8 = scmp.lt.u32.totalorder %s2384_s21, %s2862_s9 }
 0x572   :  { %p2390_p9 = pnand %p2388_p8, %p2385_p7 }
 0x574   :  { %2393 = shalt.err (!%p2390_p9)
}
 0x575   :  { %s2422_s11 = smov 128   ;;  %s2423_s13 = smov 8  }
 0x576   :  { %1794 = dma.vmem_to_hbm [thread:$0]  %s1789_s12, 256, %s2862_s9, [#allocation4], %s2422_s11, %s2422_s11, %s2423_s13  }
 0x577   :  { %2404 = dma.done.wait [#allocation4], 256  }
 0x578   :  { %2405 = vsyncadd [#allocation4], 4294967040 }
 0x579   :  { %1798 = vsyncpa [#allocation3], 1 }
 0x57a   :  { %1799 = vsyncpa [#allocation6], 1 }
 0x57b   :  { %1800 = vsyncpa [#allocation9], 1 }
 0x57c   :  { %1801 = vsyncpa [#allocation12], 1 }
 0x57d   :  { %1802 = vsyncpa [#allocation15], 1 }
 0x57e   :  { %1803 = vsyncpa [#allocation4], 1 }

</bundles_post_ra>
